<compile_context>
chip_gen: v6e
topology: v6e:2x2x1
jax: 0.10.0
libtpu: 0.0.40
codegen_flags: <defaults>
</compile_context>

<pallas_src>
import jax
import jax.numpy as jnp
from jax.experimental import pallas as pl
from jax.experimental.pallas import tpu as pltpu


def _round_up(x: int, m: int) -> int:
    return ((x + m - 1) // m) * m


def actor_kernel(x_ref, w1_ref, b1_ref, w2_ref, b2_ref, w3_ref, b3_ref, o_ref):
    # Fused 3-layer MLP on one (TILE_B, state_dim) activation tile.
    # bf16 MXU operands, f32 accumulation; all VPU/EUP work in f32.
    x = x_ref[...].astype(jnp.bfloat16)

    h1 = jnp.dot(x, w1_ref[...], preferred_element_type=jnp.float32) + b1_ref[...]
    h1 = jnp.maximum(h1, 0.0)

    h2 = jnp.dot(h1.astype(jnp.bfloat16), w2_ref[...],
                 preferred_element_type=jnp.float32) + b2_ref[...]
    h2 = jnp.maximum(h2, 0.0)

    h3 = jnp.dot(h2.astype(jnp.bfloat16), w3_ref[...],
                 preferred_element_type=jnp.float32) + b3_ref[...]
    o_ref[...] = jnp.tanh(h3).astype(o_ref.dtype)


def actor_forward(x, params, *, tile_b=512):
    """x: (batch, state_dim) f32.  params: (w1,b1,w2,b2,w3,b3) with weights
    stored (in, out) and biases (1, out).  Returns (batch, action_dim) f32."""
    w1, b1, w2, b2, w3, b3 = params
    batch, state_dim = x.shape
    hidden = w1.shape[1]
    action_dim = w3.shape[1]

    # --- lane-dense output: pad the action dim to a full 128-lane slab ------
    out_pad = _round_up(action_dim, 128)
    if out_pad != action_dim:
        w3 = jnp.pad(w3, ((0, 0), (0, out_pad - action_dim)))
        b3 = jnp.pad(b3, ((0, 0), (0, out_pad - action_dim)))

    # --- bf16 matmul operands (accumulation stays f32 in-kernel) ------------
    w1b = w1.astype(jnp.bfloat16)
    w2b = w2.astype(jnp.bfloat16)
    w3b = w3.astype(jnp.bfloat16)

    # --- batch tiling: 8-aligned tiles, pad batch to a whole grid -----------
    tb = _round_up(min(tile_b, _round_up(batch, 8)), 8)
    batch_pad = _round_up(batch, tb)
    if batch_pad != batch:
        x = jnp.pad(x, ((0, batch_pad - batch), (0, 0)))
    nb = batch_pad // tb

    cost = pl.CostEstimate(
        flops=2 * batch_pad * (state_dim * hidden + hidden * hidden + hidden * out_pad),
        transcendentals=batch_pad * out_pad,
        bytes_accessed=(x.size * 4
                        + (w1b.size + w2b.size + w3b.size) * 2
                        + (b1.size + b2.size + b3.size) * 4
                        + batch_pad * out_pad * 4),
    )

    resident = lambda i: (0, 0)  # weights/biases: same block every grid step

    out = pl.pallas_call(
        actor_kernel,
        out_shape=jax.ShapeDtypeStruct((batch_pad, out_pad), jnp.float32),
        grid_spec=pltpu.PrefetchScalarGridSpec(
            num_scalar_prefetch=0,
            grid=(nb,),
            in_specs=[
                pl.BlockSpec((tb, state_dim), lambda i: (i, 0)),   # x tile
                pl.BlockSpec((state_dim, hidden), resident),       # w1
                pl.BlockSpec((1, hidden), resident),               # b1
                pl.BlockSpec((hidden, hidden), resident),          # w2
                pl.BlockSpec((1, hidden), resident),               # b2
                pl.BlockSpec((hidden, out_pad), resident),         # w3 (padded)
                pl.BlockSpec((1, out_pad), resident),              # b3 (padded)
            ],
            out_specs=pl.BlockSpec((tb, out_pad), lambda i: (i, 0)),
        ),
        compiler_params=pltpu.CompilerParams(
            dimension_semantics=("parallel",),   # v7x: shard batch over 2 TCs
        ),
        cost_estimate=cost,
    )(x, w1b, b1, w2b, b2, w3b, b3)

    return out[:batch, :action_dim]


def init_actor_params(key, state_dim, action_dim, hidden_dim=128, init_w=0.003):
    """PyTorch-matching init: linear1/2 ~ U(-1/sqrt(fan_in), 1/sqrt(fan_in)),
    linear3 ~ U(-init_w, init_w).  Weights stored (in, out), biases (1, out)."""
    k1, k2, k3, k4, k5, k6 = jax.random.split(key, 6)

    def uniform(k, shape, bound):
        return jax.random.uniform(k, shape, jnp.float32, -bound, bound)

    bound1 = 1.0 / jnp.sqrt(state_dim)
    bound2 = 1.0 / jnp.sqrt(hidden_dim)

    w1 = uniform(k1, (state_dim, hidden_dim), bound1)
    b1 = uniform(k2, (1, hidden_dim), bound1)
    w2 = uniform(k3, (hidden_dim, hidden_dim), bound2)
    b2 = uniform(k4, (1, hidden_dim), bound2)
    w3 = uniform(k5, (hidden_dim, action_dim), init_w)
    b3 = uniform(k6, (1, action_dim), init_w)
    return (w1, b1, w2, b2, w3, b3)


def _ref_bf16(x, params):
    # Mirrors kernel math: bf16 matmul operands, f32 accumulate, f32 elementwise.
    w1, b1, w2, b2, w3, b3 = params
    bf = jnp.bfloat16
    h = jnp.dot(x.astype(bf), w1.astype(bf), preferred_element_type=jnp.float32) + b1
    h = jnp.maximum(h, 0.0)
    h = jnp.dot(h.astype(bf), w2.astype(bf), preferred_element_type=jnp.float32) + b2
    h = jnp.maximum(h, 0.0)
    h = jnp.dot(h.astype(bf), w3.astype(bf), preferred_element_type=jnp.float32) + b3
    return jnp.tanh(h)


def _ref_f32(x, params):
    w1, b1, w2, b2, w3, b3 = params
    h = jnp.maximum(x @ w1 + b1, 0.0)
    h = jnp.maximum(h @ w2 + b2, 0.0)
    return jnp.tanh(h @ w3 + b3)


if __name__ == "__main__":
    state_dim = 16
    action_dim = 8
    hidden_dim = 128

    key = jax.random.PRNGKey(0)
    kx, kp, kx2 = jax.random.split(key, 3)
    params = init_actor_params(kp, state_dim, action_dim, hidden_dim)

    # Small test: single tile.
    batch = 8
    x = jax.random.normal(kx, (batch, state_dim), jnp.float32)
    out = jax.block_until_ready(actor_forward(x, params))
    assert out.shape == (batch, action_dim)
    assert jnp.allclose(out, _ref_bf16(x, params), atol=1e-5, rtol=1e-5)
    assert jnp.allclose(out, _ref_f32(x, params), atol=2e-2, rtol=2e-2)

    # Odd batch, multi-tile grid: exercises batch padding + pipelining path.
    batch2 = 52
    x2 = jax.random.normal(kx2, (batch2, state_dim), jnp.float32)
    out2 = jax.block_until_ready(actor_forward(x2, params, tile_b=16))
    assert out2.shape == (batch2, action_dim)
    assert jnp.allclose(out2, _ref_bf16(x2, params), atol=1e-5, rtol=1e-5)
    assert jnp.allclose(out2, _ref_f32(x2, params), atol=2e-2, rtol=2e-2)

    print("KERNEL_OK")
</pallas_src>

<mosaic_0001>
module attributes {stable_mosaic.version = 11 : i64} {
  func.func @actor_kernel(%arg0: i32, %arg1: memref<8x16xf32, #tpu.memory_space<vmem>>, %arg2: memref<16x128xbf16, #tpu.memory_space<vmem>>, %arg3: memref<1x128xf32, #tpu.memory_space<vmem>>, %arg4: memref<128x128xbf16, #tpu.memory_space<vmem>>, %arg5: memref<1x128xf32, #tpu.memory_space<vmem>>, %arg6: memref<128x128xbf16, #tpu.memory_space<vmem>>, %arg7: memref<1x128xf32, #tpu.memory_space<vmem>>, %arg8: memref<8x128xf32, #tpu.memory_space<vmem>>) attributes {dimension_semantics = [#tpu.dimension_semantics<parallel>], iteration_bounds = array<i64: 1>, scalar_prefetch = 0 : i64, scratch_operands = 0 : i64, tpu.core_type = #tpu.core_type<tc>, window_params = [{transform_indices = @transform_0, window_bounds = array<i64: 8, 16>}, {pipeline_mode = #tpu.pipeline_mode<synchronous>, transform_indices = @transform_1, window_bounds = array<i64: 16, 128>}, {pipeline_mode = #tpu.pipeline_mode<synchronous>, transform_indices = @transform_2, window_bounds = array<i64: 1, 128>}, {pipeline_mode = #tpu.pipeline_mode<synchronous>, transform_indices = @transform_3, window_bounds = array<i64: 128, 128>}, {pipeline_mode = #tpu.pipeline_mode<synchronous>, transform_indices = @transform_4, window_bounds = array<i64: 1, 128>}, {pipeline_mode = #tpu.pipeline_mode<synchronous>, transform_indices = @transform_5, window_bounds = array<i64: 128, 128>}, {pipeline_mode = #tpu.pipeline_mode<synchronous>, transform_indices = @transform_6, window_bounds = array<i64: 1, 128>}, {transform_indices = @transform_7, window_bounds = array<i64: 8, 128>}]} {
    %c0 = arith.constant 0 : index
    %c0_0 = arith.constant 0 : index
    %0 = vector.load %arg1[%c0, %c0_0] : memref<8x16xf32, #tpu.memory_space<vmem>>, vector<8x16xf32>
    %1 = arith.truncf %0 : vector<8x16xf32> to vector<8x16xbf16>
    %c0_1 = arith.constant 0 : index
    %c0_2 = arith.constant 0 : index
    %2 = vector.load %arg2[%c0_1, %c0_2] : memref<16x128xbf16, #tpu.memory_space<vmem>>, vector<16x128xbf16>
    %cst = arith.constant dense<0.000000e+00> : vector<8x128xf32>
    %3 = tpu.matmul %1, %2, %cst {dimension_numbers = #tpu.dot_dimension_numbers<[1], [0], [0], [1], [0, 0, 1, 1], [], []>} : vector<8x16xbf16>, vector<16x128xbf16>, vector<8x128xf32> -> vector<8x128xf32>
    %c0_3 = arith.constant 0 : index
    %c0_4 = arith.constant 0 : index
    %4 = vector.load %arg3[%c0_3, %c0_4] : memref<1x128xf32, #tpu.memory_space<vmem>>, vector<1x128xf32>
    %5 = vector.broadcast %4 : vector<1x128xf32> to vector<8x128xf32>
    %6 = arith.addf %3, %5 : vector<8x128xf32>
    %cst_5 = arith.constant 0.000000e+00 : f32
    %7 = vector.broadcast %cst_5 : f32 to vector<8x128xf32>
    %8 = arith.maximumf %6, %7 : vector<8x128xf32>
    %9 = arith.truncf %8 : vector<8x128xf32> to vector<8x128xbf16>
    %c0_6 = arith.constant 0 : index
    %c0_7 = arith.constant 0 : index
    %10 = vector.load %arg4[%c0_6, %c0_7] : memref<128x128xbf16, #tpu.memory_space<vmem>>, vector<128x128xbf16>
    %cst_8 = arith.constant dense<0.000000e+00> : vector<8x128xf32>
    %11 = tpu.matmul %9, %10, %cst_8 {dimension_numbers = #tpu.dot_dimension_numbers<[1], [0], [0], [1], [0, 0, 1, 1], [], []>} : vector<8x128xbf16>, vector<128x128xbf16>, vector<8x128xf32> -> vector<8x128xf32>
    %c0_9 = arith.constant 0 : index
    %c0_10 = arith.constant 0 : index
    %12 = vector.load %arg5[%c0_9, %c0_10] : memref<1x128xf32, #tpu.memory_space<vmem>>, vector<1x128xf32>
    %13 = vector.broadcast %12 : vector<1x128xf32> to vector<8x128xf32>
    %14 = arith.addf %11, %13 : vector<8x128xf32>
    %cst_11 = arith.constant 0.000000e+00 : f32
    %15 = vector.broadcast %cst_11 : f32 to vector<8x128xf32>
    %16 = arith.maximumf %14, %15 : vector<8x128xf32>
    %17 = arith.truncf %16 : vector<8x128xf32> to vector<8x128xbf16>
    %c0_12 = arith.constant 0 : index
    %c0_13 = arith.constant 0 : index
    %18 = vector.load %arg6[%c0_12, %c0_13] : memref<128x128xbf16, #tpu.memory_space<vmem>>, vector<128x128xbf16>
    %cst_14 = arith.constant dense<0.000000e+00> : vector<8x128xf32>
    %19 = tpu.matmul %17, %18, %cst_14 {dimension_numbers = #tpu.dot_dimension_numbers<[1], [0], [0], [1], [0, 0, 1, 1], [], []>} : vector<8x128xbf16>, vector<128x128xbf16>, vector<8x128xf32> -> vector<8x128xf32>
    %c0_15 = arith.constant 0 : index
    %c0_16 = arith.constant 0 : index
    %20 = vector.load %arg7[%c0_15, %c0_16] : memref<1x128xf32, #tpu.memory_space<vmem>>, vector<1x128xf32>
    %21 = vector.broadcast %20 : vector<1x128xf32> to vector<8x128xf32>
    %22 = arith.addf %19, %21 : vector<8x128xf32>
    %23 = math.tanh %22 : vector<8x128xf32>
    %c0_17 = arith.constant 0 : index
    %c0_18 = arith.constant 0 : index
    %24 = vector.load %arg8[%c0_17, %c0_18] : memref<8x128xf32, #tpu.memory_space<vmem>>, vector<8x128xf32>
    tpu.vector_store %arg8[%c0_17, %c0_18], %23 {strides = array<i32>} : memref<8x128xf32, #tpu.memory_space<vmem>>, vector<8x128xf32>,
    return
  }
  func.func @transform_0(%arg0: i32) -> (i32, i32) {
    %c0_i32 = arith.constant 0 : i32
    %c0_i32_0 = arith.constant 0 : i32
    return %arg0, %c0_i32 : i32, i32
  }
  func.func @transform_1(%arg0: i32) -> (i32, i32) {
    %c0_i32 = arith.constant 0 : i32
    %c0_i32_0 = arith.constant 0 : i32
    %c0_i32_1 = arith.constant 0 : i32
    return %c0_i32, %c0_i32_0 : i32, i32
  }
  func.func @transform_2(%arg0: i32) -> (i32, i32) {
    %c0_i32 = arith.constant 0 : i32
    %c0_i32_0 = arith.constant 0 : i32
    %c0_i32_1 = arith.constant 0 : i32
    return %c0_i32, %c0_i32_0 : i32, i32
  }
  func.func @transform_3(%arg0: i32) -> (i32, i32) {
    %c0_i32 = arith.constant 0 : i32
    %c0_i32_0 = arith.constant 0 : i32
    %c0_i32_1 = arith.constant 0 : i32
    return %c0_i32, %c0_i32_0 : i32, i32
  }
  func.func @transform_4(%arg0: i32) -> (i32, i32) {
    %c0_i32 = arith.constant 0 : i32
    %c0_i32_0 = arith.constant 0 : i32
    %c0_i32_1 = arith.constant 0 : i32
    return %c0_i32, %c0_i32_0 : i32, i32
  }
  func.func @transform_5(%arg0: i32) -> (i32, i32) {
    %c0_i32 = arith.constant 0 : i32
    %c0_i32_0 = arith.constant 0 : i32
    %c0_i32_1 = arith.constant 0 : i32
    return %c0_i32, %c0_i32_0 : i32, i32
  }
  func.func @transform_6(%arg0: i32) -> (i32, i32) {
    %c0_i32 = arith.constant 0 : i32
    %c0_i32_0 = arith.constant 0 : i32
    %c0_i32_1 = arith.constant 0 : i32
    return %c0_i32, %c0_i32_0 : i32, i32
  }
  func.func @transform_7(%arg0: i32) -> (i32, i32) {
    %c0_i32 = arith.constant 0 : i32
    %c0_i32_0 = arith.constant 0 : i32
    return %arg0, %c0_i32 : i32, i32
  }
}

</mosaic_0001>

<bundles_post_ra>
// kernel: tpu_custom_call.1
= control target key start
LH: loop header
LB: loop body
LE: loop exit
PB: predicated region body
PF: predicated region fallthrough
CT: control target
= control target key end

     0   :  { %12 = vsyncpa [#allocation3], 0  ;;  %s712_s0 = inlined_call_operand.hbm [shape: f32[8,16], index: 0, kind: input, shape index: {}]   ;;  %s713_s1 = inlined_call_operand.hbm [shape: bf16[16,128], index: 1, kind: input, shape index: {}]   ;;  %s714_s2 = inlined_call_operand.vmem [shape: f32[1,128], index: 2, kind: input, shape index: {}]   ;;  %s715_s3 = inlined_call_operand.hbm [shape: bf16[128,128], index: 3, kind: input, shape index: {}]   ;;  %s716_s4 = inlined_call_operand.vmem [shape: f32[1,128], index: 4, kind: input, shape index: {}]   ;;  %s717_s5 = inlined_call_operand.hbm [shape: bf16[128,128], index: 5, kind: input, shape index: {}]   ;;  %s718_s6 = inlined_call_operand.vmem [shape: f32[1,128], index: 6, kind: input, shape index: {}]   ;;  %s719_s7 = inlined_call_operand.hbm [shape: f32[8,128], index: 7, kind: output, shape index: {}]  }
   0x1   :  { %13 = vsyncpa [#allocation6], 0 }
   0x2   :  { %14 = vsyncpa [#allocation9], 0 }
   0x3   :  { %15 = vsyncpa [#allocation4], 0  ;;  %s610_s24 = smov [#allocation5]  }
   0x4   :  { %s31_s25 = sshll.u32 %s610_s24, 4  ;;  %s32_s25 = int_to_ptr.vmem [resolvable:$true] %s31_s25 }
   0x5   :  { %s510_s26 = scalar_lea.vmem %s32_s25, 128  ;;  %p515_p1 = scmp.lt.s32.totalorder %s32_s25, %s32_s25 }
   0x6   :  { %p511_p0 = scmp.ne.s32.totalorder %s32_s25, %s510_s26  ;;  %p516_p2 = scmp.lt.s32.totalorder %s510_s26, %s510_s26 }
   0x8   :  { %p517_p3 = por %p516_p2, %p515_p1 }
   0xa   :  { %p518_p4 = pnand %p517_p3, %p511_p0 }
   0xc   :  { %521 = shalt.err (!%p518_p4)
}
   0xd   :  { %s611_s27 = smov 64   ;;  %s612_s28 = smov 4  }
   0xe   :  { %37 = dma.hbm_to_vmem [thread:$0]  %s713_s1, 128, %s32_s25, [#allocation6], %s611_s27, %s611_s27, %s612_s28  }
   0xf   :  { %s613_s8 = smov [#allocation2]   ;;  %s614_s10 = smov [#allocation7]  }
  0x10   :  { %s22_s9 = sshll.u32 %s613_s8, 4  ;;  %s45_s11 = sshll.u32 %s614_s10, 4  ;;  %s23_s9 = int_to_ptr.vmem [resolvable:$true] %s22_s9  ;;  %s46_s11 = int_to_ptr.vmem [resolvable:$true] %s45_s11 }
  0x11   :  { %s530_s12 = scalar_lea.vmem %s23_s9, 128  ;;  %p535_p6 = scmp.lt.s32.totalorder %s23_s9, %s23_s9 }
  0x12   :  { %p531_p5 = scmp.ne.s32.totalorder %s23_s9, %s530_s12  ;;  %p536_p7 = scmp.lt.s32.totalorder %s530_s12, %s530_s12 }
  0x14   :  { %p537_p8 = por %p536_p7, %p535_p6 }
  0x16   :  { %p538_p9 = pnand %p537_p8, %p531_p5 }
  0x18   :  { %541 = shalt.err (!%p538_p9)
}
  0x19   :  { %25 = dma.hbm_to_vmem [thread:$0]  %s712_s0, 128, %s23_s9, [#allocation3]  }
  0x1a   :  { %s550_s15 = scalar_lea.vmem %s46_s11, 1024  ;;  %p555_p11 = scmp.lt.s32.totalorder %s46_s11, %s46_s11 }
  0x1b   :  { %p551_p10 = scmp.ne.s32.totalorder %s46_s11, %s550_s15  ;;  %p556_p12 = scmp.lt.s32.totalorder %s550_s15, %s550_s15 }
  0x1d   :  { %p557_p13 = por %p556_p12, %p555_p11 }
  0x1f   :  { %p558_p0 = pnand %p557_p13, %p551_p10 }
  0x21   :  { %561 = shalt.err (!%p558_p0)
}
  0x22   :  { %51 = dma.hbm_to_vmem [thread:$0]  %s715_s3, 1024, %s46_s11, [#allocation6], %s611_s27, %s611_s27, %s612_s28  }
  0x23   :  { %s615_s17 = smov [#allocation8]  }
  0x24   :  { %s59_s18 = sshll.u32 %s615_s17, 4  ;;  %s60_s18 = int_to_ptr.vmem [resolvable:$true] %s59_s18 }
  0x25   :  { %s570_s19 = scalar_lea.vmem %s60_s18, 1024  ;;  %p575_p2 = scmp.lt.s32.totalorder %s60_s18, %s60_s18 }
  0x26   :  { %p571_p1 = scmp.ne.s32.totalorder %s60_s18, %s570_s19  ;;  %p576_p3 = scmp.lt.s32.totalorder %s570_s19, %s570_s19 }
  0x28   :  { %p577_p4 = por %p576_p3, %p575_p2 }
  0x2a   :  { %p578_p5 = pnand %p577_p4, %p571_p1 }
  0x2c   :  { %581 = shalt.err (!%p578_p5)
}
  0x2d   :  { %65 = dma.hbm_to_vmem [thread:$0]  %s717_s5, 1024, %s60_s18, [#allocation9], %s611_s27, %s611_s27, %s612_s28  }
  0x2e   :  { %602 = dma.done.wait [#allocation3], 128  }
  0x2f   :  { %603 = vsyncadd [#allocation3], 4294967168 }
  0x30   :  { %604 = dma.done.wait [#allocation6], 1152  }
  0x31   :  { %605 = vsyncadd [#allocation6], 4294966144 }
  0x32   :  { %606 = dma.done.wait [#allocation9], 1024  }
  0x33   :  { %607 = vsyncadd [#allocation9], 4294966272  ;;  %v616_v0 = vmov 0.0   ;;  %vm617_vm0 = vmmov 0   ;;  %v483_v1 = vld [vmem:[#allocation5] sm:$0xff]   ;;  %v81_v2 = vld [vmem:[#allocation2] sm:$0xff] }
  0x34   :  { %428 = vmatprep.subr.bf16.mxu0 %v616_v0  ;;  %430 = vmatprep.mubr.msk.bf16.mxu0 %vm617_vm0, %v616_v0  ;;  %v82_v3 = vpack.c.bf16 %v81_v2, %v81_v2  ;;  %vm98_vm1 = vcmask 130048   ;;  %v484_v4 = vld [vmem:[#allocation7 + $0x38] sm:$0xff]   ;;  %v485_v5 = vld [vmem:[#allocation7 + $0x30] sm:$0xff]   ;;  %v486_v6 = vld [vmem:[#allocation7 + $0x28] sm:$0xff]   ;;  %s618_s24 = smov [#allocation10]  }
  0x35   :  { %434 = vmatprep.subr.bf16.mxu1 %v616_v0  ;;  %450 = vmatprep.mubr.msk.bf16.mxu1 %vm617_vm0, %v616_v0  ;;  %v487_v7 = vld [vmem:[#allocation7 + $0x20] sm:$0xff]   ;;  %v488_v8 = vld [vmem:[#allocation7 + $0x18] sm:$0xff]   ;;  %v489_v9 = vld [vmem:[#allocation7 + $0x10] sm:$0xff]  }
  0x36   :  { %429 = vmatpush3.bf16.msra.mxu0 %v483_v1  ;;  %435 = vmatpush3.bf16.msra.mxu1 %v484_v4  ;;  %v490_v10 = vld [vmem:[#allocation7 + $0x8] sm:$0xff]   ;;  %v491_v11 = vld [vmem:[#allocation7] sm:$0xff]   ;;  %v492_v12 = vld [vmem:[#allocation8 + $0x38] sm:$0xff]  }
  0x37   :  { %454 = vmatprep.subr.bf16.mxu0 %v616_v0  ;;  %436 = vmatprep.subr.bf16.mxu1 %v616_v0  ;;  %v493_v13 = vld [vmem:[#allocation8 + $0x30] sm:$0xff]   ;;  %v494_v14 = vld [vmem:[#allocation8 + $0x28] sm:$0xff]   ;;  %v495_v15 = vld [vmem:[#allocation8 + $0x20] sm:$0xff]  }
  0x38   :  { %v496_v16 = vld [vmem:[#allocation8 + $0x18] sm:$0xff]   ;;  %v497_v17 = vld [vmem:[#allocation8 + $0x10] sm:$0xff]   ;;  %v498_v26 = vld [vmem:[#allocation8 + $0x8] sm:$0xff]  }
  0x39   :  { %431 = vmatmul.mubr.msk.bf16.vlgmr.msra.gmra.mxu0 %vm98_vm1, %v82_v3  ;;  %v387_v18 = vld [vmem:[%s714_s2] ss:$0 sm:$0xff]  ;;  %v499_v27 = vld [vmem:[#allocation8] sm:$0xff]  }
  0x3a   :  { %470 = vmatprep.mubr.msk.bf16.mxu0 %vm617_vm0, %v616_v0  ;;  %437 = vmatpush3.bf16.msra.mxu1 %v485_v5  ;;  %v390_v28 = vld [vmem:[%s716_s4] ss:$0 sm:$0xff]  ;;  %s376_s4 = sshll.u32 %s618_s24, 4  ;;  %s377_s4 = int_to_ptr.vmem [resolvable:$true] %s376_s4 }
  0x3b   :  { %438 = vmatprep.subr.bf16.mxu1 %v616_v0  ;;  %455 = vmatpush3.bf16.msra.mxu0 %v492_v12  ;;  %v399_v36 = vld [vmem:[%s718_s6] ss:$0 sm:$0xff]  ;;  %s582_s25 = scalar_lea.vmem %s377_s4, 128  ;;  %p587_p7 = scmp.lt.s32.totalorder %s377_s4, %s377_s4 }
  0x3c   :  { %456 = vmatprep.subr.bf16.mxu0 %v616_v0  ;;  %p583_p6 = scmp.ne.s32.totalorder %s377_s4, %s582_s25  ;;  %p588_p8 = scmp.lt.s32.totalorder %s582_s25, %s582_s25 }
  0x3e   :  { %439 = vmatpush3.bf16.msra.mxu1 %v486_v6  ;;  %p589_p9 = por %p588_p8, %p587_p7 }
  0x3f   :  { %440 = vmatprep.subr.bf16.mxu1 %v616_v0  ;;  %457 = vmatpush3.bf16.msra.mxu0 %v493_v13 }
  0x40   :  { %458 = vmatprep.subr.bf16.mxu0 %v616_v0  ;;  %p590_p10 = pnand %p589_p9, %p583_p6 }
  0x42   :  { %441 = vmatpush3.bf16.msra.mxu1 %v487_v7 }
  0x43   :  { %442 = vmatprep.subr.bf16.mxu1 %v616_v0  ;;  %459 = vmatpush3.bf16.msra.mxu0 %v494_v14 }
  0x44   :  { %460 = vmatprep.subr.bf16.mxu0 %v616_v0 }
  0x46   :  { %443 = vmatpush3.bf16.msra.mxu1 %v488_v8 }
  0x47   :  { %444 = vmatprep.subr.bf16.mxu1 %v616_v0  ;;  %461 = vmatpush3.bf16.msra.mxu0 %v495_v15 }
  0x48   :  { %462 = vmatprep.subr.bf16.mxu0 %v616_v0 }
  0x4a   :  { %445 = vmatpush3.bf16.msra.mxu1 %v489_v9 }
  0x4b   :  { %446 = vmatprep.subr.bf16.mxu1 %v616_v0  ;;  %463 = vmatpush3.bf16.msra.mxu0 %v496_v16 }
  0x4c   :  { %464 = vmatprep.subr.bf16.mxu0 %v616_v0 }
  0x4e   :  { %447 = vmatpush3.bf16.msra.mxu1 %v490_v10 }
  0x4f   :  { %448 = vmatprep.subr.bf16.mxu1 %v616_v0  ;;  %465 = vmatpush3.bf16.msra.mxu0 %v497_v17 }
  0x50   :  { %466 = vmatprep.subr.bf16.mxu0 %v616_v0 }
  0x52   :  { %449 = vmatpush3.bf16.msra.mxu1 %v491_v11 }
  0x53   :  { %467 = vmatpush3.bf16.msra.mxu0 %v498_v26 }
  0x54   :  { %468 = vmatprep.subr.bf16.mxu0 %v616_v0 }
  0x57   :  { %469 = vmatpush3.bf16.msra.mxu0 %v499_v27 }
  0xf9   :  { %v136_v19 = vpop.f32.mrf.mxu0 }
  0xfa   :  { %v137_v20 = vadd.f32 %v387_v18, %v136_v19 }
  0xfb   :  { %v432_v21 = vpop.f32.mrf.mxu0 }
  0xfc   :  { %v142_v22 = vmax.f32 %v137_v20, 0.0 }
  0xfd   :  { %v139_v23 = vpop.f32.mrf.mxu0 }
  0xfe   :  { %v143_v24 = vpack.c.bf16 %v142_v22, %v142_v22 }
  0xff   :  { %v433_v25 = vpop.f32.mrf.mxu0 }
 0x100   :  { %451 = vmatmul.mubr.bf16.vlgmr.msra.gmra.mxu1 %v143_v24 }
 0x1c0   :  { %v249_v29 = vpop.f32.mrf.mxu1 }
 0x1c1   :  { %v250_v30 = vadd.f32 %v390_v28, %v249_v29 }
 0x1c2   :  { %v452_v31 = vpop.f32.mrf.mxu1 }
 0x1c3   :  { %v255_v32 = vmax.f32 %v250_v30, 0.0 }
 0x1c4   :  { %v252_v33 = vpop.f32.mrf.mxu1 }
 0x1c5   :  { %v256_v34 = vpack.c.bf16 %v255_v32, %v255_v32 }
 0x1c6   :  { %v453_v35 = vpop.f32.mrf.mxu1 }
 0x1c7   :  { %471 = vmatmul.mubr.bf16.vlgmr.msra.gmra.mxu0 %v256_v34 }
 0x287   :  { %v362_v37 = vpop.f32.mrf.mxu0 }
 0x288   :  { %v363_v38 = vadd.f32 %v399_v36, %v362_v37 }
 0x289   :  { %v472_v39 = vpop.f32.mrf.mxu0 }
 0x28a   :  { %500 = vtanh.f32 %v363_v38 }
 0x28b   :  { %v365_v40 = vpop.f32.mrf.mxu0 }
 0x28d   :  { %v473_v41 = vpop.f32.mrf.mxu0 }
 0x297   :  { %v501_v42 = vpop.eup %500 }
 0x298   :  { %369 = vst [vmem:[#allocation10] sm:$0xff] %v501_v42 }
 0x299   :  { %593 = shalt.err (!%p590_p10)
}
 0x29a   :  { %379 = dma.vmem_to_hbm [thread:$0]  %s377_s4, 128, %s719_s7, [#allocation4]  }
 0x29b   :  { %608 = dma.done.wait [#allocation4], 128  }
 0x29c   :  { %609 = vsyncadd [#allocation4], 4294967168 }
 0x29d   :  { %383 = vsyncpa [#allocation3], 1 }
 0x29e   :  { %384 = vsyncpa [#allocation6], 1 }
 0x29f   :  { %385 = vsyncpa [#allocation9], 1 }
 0x2a0   :  { %386 = vsyncpa [#allocation4], 1 }

</bundles_post_ra>
